<compile_context>
chip_gen: v7x
topology: tpu7x:2x2x1
jax: 0.10.0
libtpu: 0.0.40
codegen_flags: <defaults>
</compile_context>

<pallas_src>
import jax
import jax.numpy as jnp
from jax.experimental import pallas as pl
from jax.experimental.pallas import tpu as pltpu

ALPHA = 0.25
# gamma = 1.5 is hard-coded via d * sqrt(d) below.

_LANES = 128
_MAX_TM = 4096     # rows per block: 4096*128*4B = 2 MiB / input / pipeline buffer
_NCORES = 2        # leading "parallel" grid axis (v7x megacore split)


def _round_up(x, m):
    return ((x + m - 1) // m) * m


def _qfocal_kernel(pred_ref, true_ref, out_ref):
    i = pl.program_id(1)

    @pl.when(i == 0)
    def _():
        out_ref[...] = jnp.zeros_like(out_ref)

    x = pred_ref[...].astype(jnp.float32)   # logits (cast in-kernel)
    y = true_ref[...].astype(jnp.float32)   # quality targets

    # One shared transcendental: e = exp(-|x|) feeds both the numerically
    # stable BCE-with-logits term and the sigmoid.
    e = jnp.exp(-jnp.abs(x))
    bce = jnp.maximum(x, 0.0) - x * y + jnp.log1p(e)
    sig = jnp.where(x >= 0, 1.0, e) / (1.0 + e)          # sigmoid(x)

    alpha_factor = y * ALPHA + (1.0 - y) * (1.0 - ALPHA)
    d = jnp.abs(y - sig)
    mod = d * jnp.sqrt(d)                                 # |y - p| ** 1.5
    loss = bce * alpha_factor * mod

    # Reduce the (tm,128) block to an (8,128) partial with pure VPU adds
    # (sum over whole vregs); keep it resident in the per-core output block.
    tm = loss.shape[0]
    partial = jnp.sum(loss.reshape(tm // 8, 8, _LANES), axis=0)
    out_ref[...] += partial.reshape(1, 8, _LANES)


def qfocal_loss(pred, true):
    """Fused QFocalLoss(gamma=1.5, alpha=0.25) over BCEWithLogitsLoss(reduction='mean')."""
    assert pred.shape == true.shape
    n = pred.size
    assert 0 < n < 2**31, "int32 element count assumed"

    rows = -(-n // _LANES)                                       # cdiv(n, 128)
    tm = min(_MAX_TM, _round_up(-(-rows // _NCORES), 8))          # rows per block
    steps = -(-rows // (tm * _NCORES))                            # inner steps per core
    padded_rows = _NCORES * steps * tm
    n_pad = padded_rows * _LANES

    pred_flat = pred.reshape(-1)
    true_flat = true.reshape(-1)
    if n_pad != n:
        # Sentinel padding: logit=-100 with target=0 yields exactly 0 loss,
        # so the kernel needs no per-element mask.
        # TODO(synk): for very large, badly-aligned inputs this pad is an extra
        # HBM copy; a split aligned-prefix / tiny-remainder path would avoid it.
        pred_flat = jnp.pad(pred_flat, (0, n_pad - n), constant_values=-100.0)
        true_flat = jnp.pad(true_flat, (0, n_pad - n))
    pred2 = pred_flat.reshape(padded_rows, _LANES)
    true2 = true_flat.reshape(padded_rows, _LANES)

    in_map = lambda c, i: (c * steps + i, 0)

    partials = pl.pallas_call(
        _qfocal_kernel,
        out_shape=jax.ShapeDtypeStruct((_NCORES, 8, _LANES), jnp.float32),
        grid_spec=pltpu.PrefetchScalarGridSpec(
            num_scalar_prefetch=0,
            grid=(_NCORES, steps),
            in_specs=[
                pl.BlockSpec((tm, _LANES), in_map),
                pl.BlockSpec((tm, _LANES), in_map),
            ],
            out_specs=pl.BlockSpec((1, 8, _LANES), lambda c, i: (c, 0, 0)),
        ),
        compiler_params=pltpu.CompilerParams(
            dimension_semantics=("parallel", "arbitrary"),
            vmem_limit_bytes=32 * 1024 * 1024,
        ),
    )(pred2, true2)

    # Single epilogue reduce + mean (the wrapped BCEWithLogitsLoss default).
    return jnp.sum(partials) / jnp.float32(n)


def _qfocal_ref(pred, true):
    x = pred.astype(jnp.float32)
    y = true.astype(jnp.float32)
    bce = jnp.maximum(x, 0.0) - x * y + jnp.log1p(jnp.exp(-jnp.abs(x)))
    p = jax.nn.sigmoid(x)
    loss = bce * (y * ALPHA + (1.0 - y) * (1.0 - ALPHA)) * \
        jnp.power(jnp.abs(y - p), 1.5)
    return jnp.mean(loss)


if __name__ == "__main__":
    key = jax.random.PRNGKey(0)
    k1, k2 = jax.random.split(key)
    # NCHW like a YOLO detection head slice: batch=2, channels=4, 16x16 spatial
    pred = jax.random.normal(k1, (2, 4, 16, 16), dtype=jnp.float32)
    true = jax.random.uniform(k2, (2, 4, 16, 16), dtype=jnp.float32)

    out = qfocal_loss(pred, true)
    out = jax.block_until_ready(out)

    ref = _qfocal_ref(pred, true)
    assert jnp.allclose(out, ref, rtol=1e-5, atol=1e-6), (out, ref)
    print("KERNEL_OK")
</pallas_src>

<mosaic_0001>
module attributes {stable_mosaic.version = 11 : i64} {
  func.func @_qfocal_kernel(%arg0: i32, %arg1: i32, %arg2: memref<8x128xf32, #tpu.memory_space<vmem>>, %arg3: memref<8x128xf32, #tpu.memory_space<vmem>>, %arg4: memref<1x8x128xf32, #tpu.memory_space<vmem>>) attributes {dimension_semantics = [#tpu.dimension_semantics<parallel>, #tpu.dimension_semantics<arbitrary>], iteration_bounds = array<i64: 2, 1>, scalar_prefetch = 0 : i64, scratch_operands = 0 : i64, tpu.core_type = #tpu.core_type<tc>, window_params = [{transform_indices = @transform_0, window_bounds = array<i64: 8, 128>}, {transform_indices = @transform_1, window_bounds = array<i64: 8, 128>}, {transform_indices = @transform_2, window_bounds = array<i64: 1, 8, 128>}]} {
    %c0_i32 = arith.constant 0 : i32
    %0 = arith.cmpi eq, %arg1, %c0_i32 : i32
    %1 = arith.extui %0 : i1 to i32
    %c0_i32_0 = arith.constant 0 : i32
    %2 = arith.cmpi ne, %1, %c0_i32_0 : i32
    scf.if %2 {
      %cst_18 = arith.constant 0.000000e+00 : f32
      %41 = vector.broadcast %cst_18 : f32 to vector<1x8x128xf32>
      %c0_19 = arith.constant 0 : index
      %c0_20 = arith.constant 0 : index
      %c0_21 = arith.constant 0 : index
      %42 = vector.load %arg4[%c0_19, %c0_20, %c0_21] : memref<1x8x128xf32, #tpu.memory_space<vmem>>, vector<1x8x128xf32>
      tpu.vector_store %arg4[%c0_19, %c0_20, %c0_21], %41 {strides = array<i32>} : memref<1x8x128xf32, #tpu.memory_space<vmem>>, vector<1x8x128xf32>,
    } else {
    }
    %c0 = arith.constant 0 : index
    %c0_1 = arith.constant 0 : index
    %3 = vector.load %arg2[%c0, %c0_1] : memref<8x128xf32, #tpu.memory_space<vmem>>, vector<8x128xf32>
    %c0_2 = arith.constant 0 : index
    %c0_3 = arith.constant 0 : index
    %4 = vector.load %arg3[%c0_2, %c0_3] : memref<8x128xf32, #tpu.memory_space<vmem>>, vector<8x128xf32>
    %5 = math.absf %3 : vector<8x128xf32>
    %cst = arith.constant 0.000000e+00 : f32
    %6 = vector.broadcast %cst : f32 to vector<8x128xf32>
    %7 = arith.subf %6, %5 : vector<8x128xf32>
    %8 = math.exp %7 : vector<8x128xf32>
    %cst_4 = arith.constant 0.000000e+00 : f32
    %9 = vector.broadcast %cst_4 : f32 to vector<8x128xf32>
    %10 = arith.maximumf %3, %9 : vector<8x128xf32>
    %11 = arith.mulf %3, %4 : vector<8x128xf32>
    %12 = arith.subf %10, %11 : vector<8x128xf32>
    %13 = math.log1p %8 : vector<8x128xf32>
    %14 = arith.addf %12, %13 : vector<8x128xf32>
    %cst_5 = arith.constant 0.000000e+00 : f32
    %15 = vector.broadcast %cst_5 : f32 to vector<8x128xf32>
    %16 = arith.cmpf oge, %3, %15 : vector<8x128xf32>
    %cst_6 = arith.constant 1.000000e+00 : f32
    %17 = vector.broadcast %cst_6 : f32 to vector<8x128xf32>
    %18 = arith.select %16, %17, %8 : vector<8x128xi1>, vector<8x128xf32>
    %cst_7 = arith.constant 1.000000e+00 : f32
    %19 = vector.broadcast %cst_7 : f32 to vector<8x128xf32>
    %20 = arith.addf %19, %8 : vector<8x128xf32>
    %21 = arith.divf %18, %20 : vector<8x128xf32>
    %cst_8 = arith.constant 2.500000e-01 : f32
    %22 = vector.broadcast %cst_8 : f32 to vector<8x128xf32>
    %23 = arith.mulf %4, %22 : vector<8x128xf32>
    %cst_9 = arith.constant 1.000000e+00 : f32
    %24 = vector.broadcast %cst_9 : f32 to vector<8x128xf32>
    %25 = arith.subf %24, %4 : vector<8x128xf32>
    %cst_10 = arith.constant 7.500000e-01 : f32
    %26 = vector.broadcast %cst_10 : f32 to vector<8x128xf32>
    %27 = arith.mulf %25, %26 : vector<8x128xf32>
    %28 = arith.addf %23, %27 : vector<8x128xf32>
    %29 = arith.subf %4, %21 : vector<8x128xf32>
    %30 = math.absf %29 : vector<8x128xf32>
    %31 = math.sqrt %30 : vector<8x128xf32>
    %32 = arith.mulf %30, %31 : vector<8x128xf32>
    %33 = arith.mulf %14, %28 : vector<8x128xf32>
    %34 = arith.mulf %33, %32 : vector<8x128xf32>
    %35 = vector.shape_cast %34 : vector<8x128xf32> to vector<1x8x128xf32>
    %cst_11 = arith.constant dense<0.000000e+00> : vector<8x128xf32>
    %36 = vector.multi_reduction <add>, %35, %cst_11 [0] : vector<1x8x128xf32> to vector<8x128xf32>
    %c0_12 = arith.constant 0 : index
    %c0_13 = arith.constant 0 : index
    %c0_14 = arith.constant 0 : index
    %37 = vector.load %arg4[%c0_12, %c0_13, %c0_14] : memref<1x8x128xf32, #tpu.memory_space<vmem>>, vector<1x8x128xf32>
    %38 = vector.shape_cast %36 : vector<8x128xf32> to vector<1x8x128xf32>
    %39 = arith.addf %37, %38 : vector<1x8x128xf32>
    %c0_15 = arith.constant 0 : index
    %c0_16 = arith.constant 0 : index
    %c0_17 = arith.constant 0 : index
    %40 = vector.load %arg4[%c0_15, %c0_16, %c0_17] : memref<1x8x128xf32, #tpu.memory_space<vmem>>, vector<1x8x128xf32>
    tpu.vector_store %arg4[%c0_15, %c0_16, %c0_17], %39 {strides = array<i32>} : memref<1x8x128xf32, #tpu.memory_space<vmem>>, vector<1x8x128xf32>,
    return
  }
  func.func @transform_0(%arg0: i32, %arg1: i32) -> (i32, i32) {
    %c1_i32 = arith.constant 1 : i32
    %0 = arith.muli %arg0, %c1_i32 : i32
    %1 = arith.addi %0, %arg1 : i32
    %c0_i32 = arith.constant 0 : i32
    %c0_i32_0 = arith.constant 0 : i32
    return %1, %c0_i32 : i32, i32
  }
  func.func @transform_1(%arg0: i32, %arg1: i32) -> (i32, i32) {
    %c1_i32 = arith.constant 1 : i32
    %0 = arith.muli %arg0, %c1_i32 : i32
    %1 = arith.addi %0, %arg1 : i32
    %c0_i32 = arith.constant 0 : i32
    %c0_i32_0 = arith.constant 0 : i32
    return %1, %c0_i32 : i32, i32
  }
  func.func @transform_2(%arg0: i32, %arg1: i32) -> (i32, i32, i32) {
    %c0_i32 = arith.constant 0 : i32
    %c0_i32_0 = arith.constant 0 : i32
    %c0_i32_1 = arith.constant 0 : i32
    return %arg0, %c0_i32, %c0_i32_0 : i32, i32, i32
  }
}

</mosaic_0001>

<bundles_post_ra>
// kernel: tpu_custom_call.1
= control target key start
LH: loop header
LB: loop body
LE: loop exit
PB: predicated region body
PF: predicated region fallthrough
CT: control target
= control target key end

     0   :  { %7 = vsyncpa [#allocation3], 0  ;;  %s865_s0 = inlined_call_operand.hbm [shape: f32[16,128], index: 0, kind: input, shape index: {}]   ;;  %s866_s1 = inlined_call_operand.hbm [shape: f32[16,128], index: 1, kind: input, shape index: {}]   ;;  %s867_s2 = inlined_call_operand.hbm [shape: f32[2,8,128], index: 2, kind: output, shape index: {}]  }
   0x1   :  { %9 = vsyncpa [#allocation3 + $0x1], 0 }
   0x2   :  { %10 = vsyncpa [#allocation6], 0 }
   0x3   :  { %12 = vsyncpa [#allocation6 + $0x1], 0 }
   0x4   :  { %13 = vsyncpa [#allocation4], 0 }
   0x5   :  { %15 = vsyncpa [#allocation4 + $0x1], 0  ;;  %s640_s9 = smov 0   ;;  %s642_s10 = smov 0  }
   0x6   :  { %s644_s11 = smov 0   ;;  %s646_s12 = smov 0  }
   0x7   :  { %s648_s13 = smov 0   ;;  %s650_s14 = smov 0  }
   0x8 LB: > { %s382_s15 = sadd.s32 4294967295, %s620_s14   ;;  %s383_s16 = sadd.s32 4294967294, %s620_s14   ;;  %s620_s14 = sphi %s650_s14, %s21_s14   ;;  %s616_s13 = sphi %s648_s13, %s887_s13   ;;  %s612_s12 = sphi %s646_s12, %s886_s12   ;;  %s608_s11 = sphi %s644_s11, %s885_s11   ;;  %s604_s10 = sphi %s642_s10, %s884_s10   ;;  %s600_s9 = sphi %s640_s9, %s883_s9  }
   0x9   : > { %s33_s17 = sadd.s32 1, %s616_s13  ;;  %s42_s18 = sadd.s32 1, %s608_s11 }
   0xa   : > { %p35_p0 = scmp.ge.s32.totalorder %s33_s17, 2  ;;  %p49_p1 = scmp.ne.s32.totalorder %s608_s11, %s604_s10 }
   0xb   : > { %p50_p2 = scmp.eq.s32.totalorder %s620_s14, 0  ;;  %p55_p3 = scmp.ne.s32.totalorder %s604_s10, %s600_s9 }
   0xc   : > { %s889_s17 = smov (%p35_p0, %s33_s17), 0  ;;  %p56_p5 = scmp.eq.s32.totalorder %s382_s15, 0 }
   0xd   : > { %p681_p4 = por %p50_p2, %p49_p1  ;;  %s39_s20 = ssub.s32 %s616_s13, %s889_s17 }
   0xe   : > { %p107_p6 = scmp.eq.s32.totalorder %s382_s15, 1  ;;  %p40_p7 = scmp.eq.s32.totalorder %s39_s20, 0 }
   0xf   : > { %p687_p8 = por %p56_p5, %p55_p3  ;;  %p113_p10 = scmp.eq.s32.totalorder %s383_s16, 1 }
  0x10   : > { %p691_p9 = por %p107_p6, %p49_p1  ;;  %p415_p13 = scmp.lt.s32.totalorder %s620_s14, 2 }
  0x11   : > { %s871_s21 = scalar_select %p687_p8, 1, 0 }
  0x12   : > { %s872_s22 = scalar_select %p691_p9, 1, 0 }
  0x13   : > { %s696_s23 = scalar_select %p40_p7, %s608_s11, %s42_s18  }
  0x14   : > { %p698_p11 = por %p113_p10, %p55_p3  ;;  %s705_s25 = sand.u32 1, %s608_s11  }
  0x15   : > { %s386_s26 = sshll.u32 %s705_s25, 3  ;;  %s387_s27 = sshll.u32 %s616_s13, 7 }
  0x16   : > { %s873_s24 = scalar_select %p698_p11, 1, 0 }
  0x17   : > { %s714_s30 = scalar_lea.hbm %s865_s0, %s387_s27  ;;  %s137_s3 = scalar_lea.vmem [#allocation2], %s386_s26 }
  0x18   : > { %s145_s4 = sshll.u32 %s137_s3, 4  ;;  %p722_p0 = pnand %p415_p13, %p681_p4  ;;  %s718_s4 = int_to_ptr.vmem [resolvable:$true] %s145_s4 }
  0x19   : > { %s134_s6 = scalar_lea.sflag [#allocation3], %s705_s25  ;;  %s474_s7 = scalar_lea.hbm %s714_s30, 128 }
  0x1a   : > { %p475_p3 = scmp.ne.s32.totalorder %s714_s30, %s474_s7  ;;  %p476_p5 = pneg %p722_p0 }
  0x1b   : > { %s479_s16 = scalar_lea.hbm %s865_s0, 256  ;;  %p480_p4 = scmp.lt.u32.totalorder %s714_s30, %s865_s0 }
  0x1c   : > { %p477_p6 = pnand %p476_p5, %p475_p3  ;;  %p481_p10 = scmp.lt.u32.totalorder %s479_s16, %s474_s7 }
  0x1d   : > { %p483_p12 = scmp.lt.u32.totalorder %s474_s7, %s714_s30 }
  0x1e   : > { %p478_p7 = pneg %p477_p6  ;;  %p482_p13 = por %p481_p10, %p480_p4 }
  0x20   : > { %p484_p1 = por %p483_p12, %p482_p13 }
  0x22   : > { %p485_p2 = pnand %p484_p1, %p478_p7 }
  0x24   : > { %488 = shalt.err (!%p485_p2)
}
  0x25   : > { %s489_s20 = scalar_lea.vmem %s718_s4, 128  ;;  %s622_s28 = smov [#allocation2]  }
  0x26   : > { %p490_p3 = scmp.ne.s32.totalorder %s718_s4, %s489_s20  ;;  %s494_s29 = sshll.u32 %s622_s28, 4  ;;  %s495_s29 = int_to_ptr.vmem [resolvable:$false] %s494_s29 }
  0x27   : > { %s496_s3 = scalar_lea.vmem %s495_s29, 256  ;;  %p497_p9 = scmp.lt.s32.totalorder %s718_s4, %s495_s29 }
  0x28   : > { %p492_p6 = pnand %p490_p3, %p476_p5  ;;  %p498_p4 = scmp.lt.s32.totalorder %s496_s3, %s489_s20 }
  0x2a   : > { %p493_p11 = pneg %p492_p6  ;;  %p499_p10 = por %p498_p4, %p497_p9 }
  0x2c   : > { %p500_p12 = pnand %p499_p10, %p493_p11 }
  0x2e   : > { %503 = shalt.err (!%p500_p12)
}
  0x2f   : > { %407 = dma.hbm_to_vmem [thread:$0]  (!%p722_p0), %s714_s30, 128, %s718_s4, %s134_s6  }
  0x30   : > { %p875_p1 = scmp.lt.s32.totalorder %s620_s14, 3  ;;  %p876_p2 = scmp.ge.s32.totalorder %s620_s14, 1 }
  0x31   : > { %s767_s16 = scalar_lea.hbm %s866_s1, %s387_s27  ;;  %s156_s18 = scalar_lea.vmem [#allocation5], %s386_s26 }
  0x32   : > { %p758_p7 = pnand %p876_p2, %p875_p1  ;;  %s164_s19 = sshll.u32 %s156_s18, 4  ;;  %s165_s19 = int_to_ptr.vmem [resolvable:$true] %s164_s19 }
  0x33   : > { %s153_s30 = scalar_lea.sflag [#allocation6], %s705_s25  ;;  %s504_s4 = scalar_lea.hbm %s767_s16, 128 }
  0x34   : > { %s877_s7 = scalar_select %p758_p7, 1, 0 }
  0x35   : > { %p505_p9 = scmp.ne.s32.totalorder %s767_s16, %s504_s4  ;;  %s509_s27 = scalar_lea.hbm %s866_s1, 256 }
  0x36   : > { %p510_p3 = scmp.lt.u32.totalorder %s767_s16, %s866_s1  ;;  %p511_p6 = scmp.lt.u32.totalorder %s509_s27, %s504_s4 }
  0x37   : > { %p507_p11 = pnand %p505_p9, %p476_p5  ;;  %p513_p10 = scmp.lt.u32.totalorder %s504_s4, %s767_s16 }
  0x38   : > { %p512_p4 = por %p511_p6, %p510_p3 }
  0x39   : > { %p508_p13 = pneg %p507_p11 }
  0x3a   : > { %p514_p12 = por %p513_p10, %p512_p4 }
  0x3c   : > { %p515_p1 = pnand %p514_p12, %p508_p13 }
  0x3e   : > { %518 = shalt.err (!%p515_p1)
}
  0x3f   : > { %s519_s25 = scalar_lea.vmem %s165_s19, 128  ;;  %s623_s26 = smov [#allocation5]  }
  0x40   : > { %p520_p2 = scmp.ne.s32.totalorder %s165_s19, %s519_s25  ;;  %s524_s3 = sshll.u32 %s623_s26, 4  ;;  %s525_s3 = int_to_ptr.vmem [resolvable:$false] %s524_s3 }
  0x41   : > { %s526_s8 = scalar_lea.vmem %s525_s3, 256  ;;  %p527_p8 = scmp.lt.s32.totalorder %s165_s19, %s525_s3 }
  0x42   : > { %p522_p9 = pnand %p520_p2, %p476_p5  ;;  %p528_p7 = scmp.lt.s32.totalorder %s526_s8, %s519_s25 }
  0x44   : > { %p523_p11 = pneg %p522_p9  ;;  %p529_p3 = por %p528_p7, %p527_p8 }
  0x46   : > { %p530_p6 = pnand %p529_p3, %p523_p11 }
  0x48   : > { %533 = shalt.err (!%p530_p6)
}
  0x49   : > { %410 = dma.hbm_to_vmem [thread:$0]  (!%p722_p0), %s767_s16, 128, %s165_s19, %s153_s30  }
  0x4a   : > { %p878_p13 = scmp.ne.s32.totalorder %s877_s7, 0 }
  0x4b   : > { %s794_s15 = sand.u32 (!%p878_p13), 1, %s604_s10   ;;  %p879_p8 = scmp.ne.s32.totalorder (!%p878_p13), %s871_s21, 0 }
  0x4c   : > { %173 = sbr.rel (%p878_p13) target bundleno = 156 (0x9c), region = 28  ;;  %s797_s18 = sshll.u32 (!%p878_p13), %s794_s15, 3 }
  0x4d   : > { %s176_s4 = scalar_lea.sflag (!%p878_p13), [#allocation3], %s794_s15  ;;  %s179_s6 = scalar_lea.vmem (!%p878_p13), [#allocation2], %s797_s18 }
  0x53   : > { %587 = dma.done.wait (%p879_p8), %s176_s4, 128  }
  0x54   : > { %589 = vsyncadd (%p879_p8), %s176_s4, 4294967168  ;;  %s185_s5 = scalar_lea.sflag [#allocation6], %s794_s15  ;;  %s188_s7 = scalar_lea.vmem [#allocation5], %s797_s18 }
  0x55   : > { %591 = dma.done.wait (%p879_p8), %s185_s5, 128  }
  0x56   : > { %593 = vsyncadd (%p879_p8), %s185_s5, 4294967168  ;;  %v221_v0 = vld [vmem:[%s179_s6] sm:$0xff]  ;;  %v222_v8 = vld [vmem:[%s188_s7] sm:$0xff]  ;;  %s395_s21 = sshll.u32 %s612_s12, 7  ;;  %s213_s16 = scalar_lea.vmem [#allocation7], %s797_s18 }
  0x57   : > { %v223_v1 = vand.u32 2147483647, %v221_v0  ;;  %vm240_vm0 = vcmp.ge.f32.partialorder %v221_v0, 0.0  ;;  %v227_v16 = vmax.f32 %v221_v0, 0.0  ;;  %v228_v17 = vmul.f32 %v222_v8, %v221_v0  ;;  %s279_s19 = sshll.u32 %s213_s16, 4  ;;  %s816_s27 = scalar_lea.hbm %s867_s2, %s395_s21  ;;  %s818_s19 = int_to_ptr.vmem [resolvable:$true] %s279_s19 }
  0x58   : > { %v246_v18 = vsub.f32 1.0, %v222_v8  ;;  %v245_v22 = vmul.f32 0.25, %v222_v8  ;;  %s266_s28 = scalar_lea.sflag [#allocation4], %s794_s15  ;;  %s534_s29 = scalar_lea.vmem %s818_s19, 128 }
  0x59   : > { %v224_v2 = vsub.f32 0.0, %v223_v1  ;;  %v229_v21 = vsub.f32 %v227_v16, %v228_v17  ;;  %p535_p0 = scmp.ne.s32.totalorder %s818_s19, %s534_s29  ;;  %p880_p5 = scmp.ne.s32.totalorder %s872_s22, 0 }
  0x5a   : > { %v247_v23 = vmul.f32 0.75, %v246_v18  ;;  %s624_s12 = smov [#allocation7]  }
  0x5b   : > { %v225_v3 = vmul.f32 1.442695, %v224_v2  ;;  %p536_p7 = pnand %p535_p0, %p880_p5  ;;  %s538_s25 = sshll.u32 %s624_s12, 4  ;;  %s539_s25 = int_to_ptr.vmem [resolvable:$false] %s538_s25 }
  0x5c   : > { %v248_v26 = vadd.f32 %v247_v23, %v245_v22  ;;  %s540_s26 = scalar_lea.vmem %s539_s25, 256  ;;  %p541_p10 = scmp.lt.s32.totalorder %s818_s19, %s539_s25 }
  0x5d   : > { %466 = vpow2.f32 %v225_v3  ;;  %p537_p4 = pneg %p536_p7  ;;  %p542_p12 = scmp.lt.s32.totalorder %s540_s26, %s534_s29 }
  0x5f   : > { %p543_p1 = por %p542_p12, %p541_p10 }
  0x61   : > { %p544_p2 = pnand %p543_p1, %p537_p4 }
  0x67   : > { %v467_v4 = vpop.eup %466 }
  0x68   : > { %v230_v5 = vadd.f32 1.0, %v467_v4  ;;  %v241_v6 = vsel %vm240_vm0, 1.0, %v467_v4  ;;  %v233_v9 = vmul.f32 -0.5, %v467_v4  ;;  %v236_v15 = vand.u32 2147483647, %v467_v4 }
  0x6a   : > { %468 = vrcp.f32 %v230_v5  ;;  %v234_v12 = vadd.f32 1.0, %v233_v9  ;;  %vm237_vm1 = vcmp.lt.f32.partialorder %v236_v15, 0.0004427343 }
  0x6b   : > { %470 = vlog2.f32 %v230_v5 }
  0x6c   : > { %v235_v20 = vmul.f32 %v467_v4, %v234_v12 }
  0x74   : > { %v469_v7 = vpop.eup %468 }
  0x75   : > { %v244_v10 = vmul.f32 %v469_v7, %v241_v6  ;;  %v471_v14 = vpop.eup %470 }
  0x76   : > { %v232_v19 = vmul.f32 0.6931472, %v471_v14 }
  0x77   : > { %v249_v11 = vsub.f32 %v222_v8, %v244_v10 }
  0x78   : > { %v238_v24 = vsel %vm237_vm1, %v235_v20, %v232_v19 }
  0x79   : > { %v250_v13 = vand.u32 2147483647, %v249_v11  ;;  %v239_v25 = vadd.f32 %v238_v24, %v229_v21 }
  0x7b   : > { %472 = vrsqrt.f32 %v250_v13  ;;  %vm253_vm2 = vcmp.eq.f32.partialorder %v250_v13, inf  ;;  %v256_v28 = vand.u32 2147483648, %v250_v13  ;;  %vm255_vm3 = vcmp.eq.f32.partialorder %v250_v13, 0.0 }
  0x7c   : > { %v259_v31 = vmul.f32 %v248_v26, %v239_v25 }
  0x85   : > { %v473_v27 = vpop.eup %472 }
  0x86   : > { %v252_v29 = vmul.f32 %v473_v27, %v250_v13 }
  0x88   : > { %v254_v30 = vsel %vm253_vm2, %v250_v13, %v252_v29 }
  0x89   : > { %v257_v32 = vsel %vm255_vm3, %v256_v28, %v254_v30 }
  0x8a   : > { %v258_v33 = vmul.f32 %v257_v32, %v250_v13 }
  0x8c   : > { %v260_v34 = vmul.f32 %v259_v31, %v258_v33 }
  0x8e   : > { %264 = vst [vmem:[%s213_s16] sm:$0xff] %v260_v34 }
  0x8f   : > { %547 = shalt.err (!%p544_p2)
}
  0x90   : > { %s548_s3 = scalar_lea.hbm %s816_s27, 128  ;;  %s552_s18 = scalar_lea.hbm %s867_s2, 256 }
  0x91   : > { %p549_p9 = scmp.ne.s32.totalorder %s816_s27, %s548_s3  ;;  %p553_p6 = scmp.lt.u32.totalorder %s816_s27, %s867_s2 }
  0x92   : > { %p554_p13 = scmp.lt.u32.totalorder %s552_s18, %s548_s3  ;;  %p556_p0 = scmp.lt.u32.totalorder %s548_s3, %s816_s27 }
  0x93   : > { %p550_p11 = pnand %p549_p9, %p880_p5 }
  0x94   : > { %p555_p8 = por %p554_p13, %p553_p6 }
  0x95   : > { %p551_p3 = pneg %p550_p11 }
  0x96   : > { %p557_p7 = por %p556_p0, %p555_p8 }
  0x98   : > { %p558_p4 = pnand %p557_p7, %p551_p3 }
  0x9a   : > { %561 = shalt.err (!%p558_p4)
}
  0x9b   : > { %402 = dma.vmem_to_hbm [thread:$0]  (%p880_p5), %s818_s19, 128, %s816_s27, %s266_s28  }
  0x9c PF: > { %s291_s5 = sand.u32 1, %s600_s9   ;;  %p881_p10 = scmp.ne.s32.totalorder %s873_s24, 0 }
  0x9d   : > { %p882_p12 = scmp.ge.s32.totalorder %s620_s14, 2  ;;  %s292_s7 = scalar_lea.sflag [#allocation4], %s291_s5 }
  0x9f   : > { %p412_p1 = pnand %p882_p12, %p881_p10 }
  0xa1   : > { %595 = dma.done.wait (!%p412_p1), %s292_s7, 128  }
  0xa2   : > { %597 = vsyncadd (!%p412_p1), %s292_s7, 4294967168  ;;  %s21_s14 = sadd.s32 1, %s620_s14   ;;  %s883_s9 = smov %s604_s10 }
  0xa3   : > { %p18_p2 = scmp.ge.s32.totalorder %s21_s14, 4   ;;  %s884_s10 = smov %s608_s11 }
  0xa4   : > { %s885_s11 = smov %s696_s23  ;;  %s886_s12 = smov %s616_s13 }
  0xa5   : > { %s887_s13 = smov %s889_s17  ;;  %20 = sbr.rel (!%p18_p2) target bundleno = 8 (0x8), region = 90 }
  0xac   :  { %297 = vsyncpa [#allocation3], 1 }
  0xad   :  { %299 = vsyncpa [#allocation3 + $0x1], 1 }
  0xae   :  { %300 = vsyncpa [#allocation6], 1 }
  0xaf   :  { %302 = vsyncpa [#allocation6 + $0x1], 1 }
  0xb0   :  { %303 = vsyncpa [#allocation4], 1 }
  0xb1   :  { %305 = vsyncpa [#allocation4 + $0x1], 1 }

</bundles_post_ra>
